<compile_context>
chip_gen: v6e
topology: v6e:2x2x1
jax: 0.10.0
libtpu: 0.0.40
codegen_flags: <defaults>
</compile_context>

<pallas_src>
import math

import jax
import jax.numpy as jnp
from jax.experimental import pallas as pl
from jax.experimental.pallas import tpu as pltpu


def _pos_embed_kernel(y_ref, x_ref, out_ref):
    """Pure broadcast-writer for one (F, th, W) output block.

    Grid axis 0 selects the channel half:
      half 0 (y rows): out[f, h, w] = y_tab[f, h]  -> lane broadcast of (F, th, 1)
      half 1 (x rows): out[f, h, w] = x_tab[f, w]  -> sublane broadcast of (F, 1, W)
    """
    half = pl.program_id(0)

    @pl.when(half == 0)
    def _():
        out_ref[...] = jnp.broadcast_to(y_ref[...], out_ref.shape).astype(out_ref.dtype)

    @pl.when(half == 1)
    def _():
        out_ref[...] = jnp.broadcast_to(x_ref[...], out_ref.shape).astype(out_ref.dtype)


def _pick_row_tile(H, W, num_pos_feats, out_itemsize,
                   budget_bytes=10 * 1024 * 1024):
    """Rows per output block (multiple of 8, or == H).

    Sized so (output block + y/x table blocks), all double-buffered, fit a
    conservative VMEM budget valid on every TPU generation (incl. v5e's 16 MiB
    default scoped VMEM and v7x's 64 MiB physical VMEM).
    """
    F = num_pos_feats
    w_pad = max(128, -(-W // 128) * 128)
    # Per extra row of th (x2 for double buffering):
    #   output block row:  F * w_pad * itemsize
    #   y-table block row: (F, th, 1) f32 is lane-padded -> ~512 B per row per feature
    per_row = 2 * (F * w_pad * out_itemsize + F * 512)
    # Fixed: (F, 1, W) f32 x-table block (sublane-padded to 8), double-buffered.
    fixed = 2 * (F * 8 * w_pad * 4)
    th = (budget_bytes - fixed) // per_row
    if th >= H:
        return H
    th = max(8, int(th) // 8 * 8)
    return min(th, H)


def position_embedding_sine(x, num_pos_feats=64, temperature=10000,
                            normalize=False, scale=None, dtype=jnp.float32):
    """Equivalent of PositionEmbeddingSine.forward(x) for NCHW input x.

    Only x.shape is used: the PyTorch module builds its own all-ones mask, so
    the embedding is a pure function of (H, W) and identical for every batch
    element.
    """
    if scale is not None and normalize is False:
        raise ValueError("normalize should be True if scale is passed")
    if scale is None:
        scale = 2.0 * math.pi

    B, _, H, W = x.shape
    F = num_pos_feats
    C_out = 2 * F

    # ---- tiny exact per-axis tables: F*(H+W) sin/cos values (plain XLA) ----
    dim_idx = jnp.arange(F, dtype=jnp.float32)
    dim_t = jnp.float32(temperature) ** (2.0 * jnp.floor(dim_idx / 2.0) / F)   # (F,)
    even = (jnp.arange(F) % 2 == 0)[:, None]                                   # (F, 1)

    y_coord = jnp.arange(1, H + 1, dtype=jnp.float32)   # cumsum of ones along H
    x_coord = jnp.arange(1, W + 1, dtype=jnp.float32)   # cumsum of ones along W
    if normalize:
        eps = 1e-6
        y_coord = (y_coord - 0.5) / (float(H) + eps) * scale   # y_embed[:, -1:, :] == H
        x_coord = (x_coord - 0.5) / (float(W) + eps) * scale   # x_embed[:, :, -1:] == W

    vy = y_coord[None, :] / dim_t[:, None]                 # (F, H)
    vx = x_coord[None, :] / dim_t[:, None]                 # (F, W)
    y_tab = jnp.where(even, jnp.sin(vy), jnp.cos(vy)).reshape(F, H, 1)
    x_tab = jnp.where(even, jnp.sin(vx), jnp.cos(vx)).reshape(F, 1, W)

    th = _pick_row_tile(H, W, F, jnp.dtype(dtype).itemsize)
    n_h = -(-H // th)   # cdiv; Pallas masks the ragged final row block

    pos = pl.pallas_call(
        _pos_embed_kernel,
        out_shape=jax.ShapeDtypeStruct((C_out, H, W), dtype),
        grid=(2, n_h),
        in_specs=[
            pl.BlockSpec((F, th, 1), lambda c, i: (0, i, 0)),   # y table rows
            pl.BlockSpec((F, 1, W), lambda c, i: (0, 0, 0)),    # x table (resident)
        ],
        out_specs=pl.BlockSpec((F, th, W), lambda c, i: (c, i, 0)),
        compiler_params=pltpu.CompilerParams(
            dimension_semantics=("parallel", "parallel"),
            vmem_limit_bytes=32 * 1024 * 1024),
    )(y_tab, x_tab)

    # Batch-invariant: keep the B-fold broadcast lazy (fuses into the consumer
    # under jit) rather than writing B copies of the slab to HBM.
    return jnp.broadcast_to(pos[None], (B, C_out, H, W))


def _reference_jax(x, num_pos_feats=64, temperature=10000,
                   normalize=False, scale=None):
    """Pure-JAX reference mirroring the PyTorch forward."""
    if scale is None:
        scale = 2.0 * math.pi
    B, _, H, W = x.shape
    y_embed = jnp.broadcast_to(
        jnp.arange(1, H + 1, dtype=jnp.float32)[None, :, None], (B, H, W))
    x_embed = jnp.broadcast_to(
        jnp.arange(1, W + 1, dtype=jnp.float32)[None, None, :], (B, H, W))
    if normalize:
        eps = 1e-6
        y_embed = (y_embed - 0.5) / (y_embed[:, -1:, :] + eps) * scale
        x_embed = (x_embed - 0.5) / (x_embed[:, :, -1:] + eps) * scale
    dim_t = jnp.arange(num_pos_feats, dtype=jnp.float32)
    dim_t = temperature ** (2.0 * jnp.floor(dim_t / 2.0) / num_pos_feats)
    pos_x = x_embed[..., None] / dim_t
    pos_y = y_embed[..., None] / dim_t
    pos_x = jnp.stack((jnp.sin(pos_x[..., 0::2]), jnp.cos(pos_x[..., 1::2])),
                      axis=4).reshape(B, H, W, num_pos_feats)
    pos_y = jnp.stack((jnp.sin(pos_y[..., 0::2]), jnp.cos(pos_y[..., 1::2])),
                      axis=4).reshape(B, H, W, num_pos_feats)
    pos = jnp.concatenate((pos_y, pos_x), axis=3)
    return jnp.transpose(pos, (0, 3, 1, 2))


if __name__ == "__main__":
    key = jax.random.PRNGKey(0)
    # Small NCHW input consistent with the module (only its shape is used).
    x = jax.random.normal(key, (2, 4, 16, 16), dtype=jnp.float32)

    # normalize=False path (the module default)
    pos = jax.block_until_ready(
        position_embedding_sine(x, num_pos_feats=64, temperature=10000,
                                normalize=False))
    assert pos.shape == (2, 128, 16, 16), pos.shape
    ref = jax.block_until_ready(_reference_jax(x, num_pos_feats=64))
    assert jnp.allclose(pos, ref, atol=1e-5, rtol=1e-5), \
        float(jnp.max(jnp.abs(pos - ref)))

    # normalize=True path
    pos_n = jax.block_until_ready(
        position_embedding_sine(x, num_pos_feats=64, temperature=10000,
                                normalize=True))
    ref_n = jax.block_until_ready(_reference_jax(x, num_pos_feats=64,
                                                 normalize=True))
    assert jnp.allclose(pos_n, ref_n, atol=1e-5, rtol=1e-5), \
        float(jnp.max(jnp.abs(pos_n - ref_n)))

    # bf16 output option (halves HBM writeback when the consumer runs in bf16)
    pos_b = jax.block_until_ready(
        position_embedding_sine(x, num_pos_feats=64, dtype=jnp.bfloat16))
    assert pos_b.shape == (2, 128, 16, 16) and pos_b.dtype == jnp.bfloat16
    assert jnp.allclose(pos_b.astype(jnp.float32), ref, atol=2e-2), \
        float(jnp.max(jnp.abs(pos_b.astype(jnp.float32) - ref)))

    print("KERNEL_OK")
</pallas_src>

<mosaic_0001>
module attributes {stable_mosaic.version = 11 : i64} {
  func.func @_pos_embed_kernel(%arg0: i32, %arg1: i32, %arg2: memref<64x16x1xf32, #tpu.memory_space<vmem>>, %arg3: memref<64x1x16xf32, #tpu.memory_space<vmem>>, %arg4: memref<64x16x16xf32, #tpu.memory_space<vmem>>) attributes {dimension_semantics = [#tpu.dimension_semantics<parallel>, #tpu.dimension_semantics<parallel>], iteration_bounds = array<i64: 2, 1>, scalar_prefetch = 0 : i64, scratch_operands = 0 : i64, tpu.core_type = #tpu.core_type<tc>, window_params = [{transform_indices = @transform_0, window_bounds = array<i64: 64, 16, 1>}, {pipeline_mode = #tpu.pipeline_mode<synchronous>, transform_indices = @transform_1, window_bounds = array<i64: 64, 1, 16>}, {transform_indices = @transform_2, window_bounds = array<i64: 64, 16, 16>}]} {
    %c0_i32 = arith.constant 0 : i32
    %0 = arith.cmpi eq, %arg0, %c0_i32 : i32
    %1 = arith.extui %0 : i1 to i32
    %c0_i32_0 = arith.constant 0 : i32
    %2 = arith.cmpi ne, %1, %c0_i32_0 : i32
    scf.if %2 {
      %c0 = arith.constant 0 : index
      %c0_2 = arith.constant 0 : index
      %c0_3 = arith.constant 0 : index
      %6 = vector.load %arg2[%c0, %c0_2, %c0_3] : memref<64x16x1xf32, #tpu.memory_space<vmem>>, vector<64x16x1xf32>
      %7 = vector.shape_cast %6 : vector<64x16x1xf32> to vector<64x16x1xf32>
      %8 = vector.broadcast %7 : vector<64x16x1xf32> to vector<64x16x16xf32>
      %c0_4 = arith.constant 0 : index
      %c0_5 = arith.constant 0 : index
      %c0_6 = arith.constant 0 : index
      %9 = vector.load %arg4[%c0_4, %c0_5, %c0_6] : memref<64x16x16xf32, #tpu.memory_space<vmem>>, vector<64x16x16xf32>
      tpu.vector_store %arg4[%c0_4, %c0_5, %c0_6], %8 {strides = array<i32>} : memref<64x16x16xf32, #tpu.memory_space<vmem>>, vector<64x16x16xf32>,
    } else {
    }
    %c1_i32 = arith.constant 1 : i32
    %3 = arith.cmpi eq, %arg0, %c1_i32 : i32
    %4 = arith.extui %3 : i1 to i32
    %c0_i32_1 = arith.constant 0 : i32
    %5 = arith.cmpi ne, %4, %c0_i32_1 : i32
    scf.if %5 {
      %c0 = arith.constant 0 : index
      %c0_2 = arith.constant 0 : index
      %c0_3 = arith.constant 0 : index
      %6 = vector.load %arg3[%c0, %c0_2, %c0_3] : memref<64x1x16xf32, #tpu.memory_space<vmem>>, vector<64x1x16xf32>
      %7 = vector.shape_cast %6 : vector<64x1x16xf32> to vector<64x1x16xf32>
      %8 = vector.broadcast %7 : vector<64x1x16xf32> to vector<64x16x16xf32>
      %c0_4 = arith.constant 0 : index
      %c0_5 = arith.constant 0 : index
      %c0_6 = arith.constant 0 : index
      %9 = vector.load %arg4[%c0_4, %c0_5, %c0_6] : memref<64x16x16xf32, #tpu.memory_space<vmem>>, vector<64x16x16xf32>
      tpu.vector_store %arg4[%c0_4, %c0_5, %c0_6], %8 {strides = array<i32>} : memref<64x16x16xf32, #tpu.memory_space<vmem>>, vector<64x16x16xf32>,
    } else {
    }
    return
  }
  func.func @transform_0(%arg0: i32, %arg1: i32) -> (i32, i32, i32) {
    %c0_i32 = arith.constant 0 : i32
    %c0_i32_0 = arith.constant 0 : i32
    %c0_i32_1 = arith.constant 0 : i32
    return %c0_i32, %arg1, %c0_i32_0 : i32, i32, i32
  }
  func.func @transform_1(%arg0: i32, %arg1: i32) -> (i32, i32, i32) {
    %c0_i32 = arith.constant 0 : i32
    %c0_i32_0 = arith.constant 0 : i32
    %c0_i32_1 = arith.constant 0 : i32
    %c0_i32_2 = arith.constant 0 : i32
    return %c0_i32, %c0_i32_0, %c0_i32_1 : i32, i32, i32
  }
  func.func @transform_2(%arg0: i32, %arg1: i32) -> (i32, i32, i32) {
    %c0_i32 = arith.constant 0 : i32
    %c0_i32_0 = arith.constant 0 : i32
    return %arg0, %arg1, %c0_i32 : i32, i32, i32
  }
}

</mosaic_0001>

<bundles_post_ra>
// kernel: tpu_custom_call.1
= control target key start
LH: loop header
LB: loop body
LE: loop exit
PB: predicated region body
PF: predicated region fallthrough
CT: control target
= control target key end

     0   :  { %s1885_s9 = smov 0   ;;  %s1887_s10 = smov 0   ;;  %s3010_s0 = inlined_call_operand.vmem [shape: f32[64,16,1], index: 0, kind: input, shape index: {}]   ;;  %s3011_s1 = inlined_call_operand.vmem [shape: f32[64,1,16], index: 1, kind: input, shape index: {}]   ;;  %s3012_s2 = inlined_call_operand.vmem [shape: f32[128,16,16], index: 2, kind: output, shape index: {}]  }
   0x1   :  { %s1889_s11 = smov 0  }
   0x2 LB: > { %s24_s12 = sadd.s32 1, %s1863_s10  ;;  %p1745_p0 = scmp.ge.s32.totalorder %s1867_s11, 1  ;;  %s1867_s11 = sphi %s1889_s11, %s12_s11   ;;  %s1863_s10 = sphi %s1887_s10, %s3014_s10   ;;  %s1859_s9 = sphi %s1885_s9, %s3013_s9  }
   0x3   : > { %p26_p1 = scmp.ge.s32.totalorder %s24_s12, 2  ;;  %p127_p2 = scmp.lt.s32.totalorder %s1867_s11, 3 }
   0x5   : > { %s3016_s12 = smov (%p26_p1, %s24_s12), 0  ;;  %p128_p3 = pnand %p1745_p0, %p127_p2 }
   0x6   : > { %s1746_s13 = sshll.u32 (!%p128_p3), %s1859_s9, 6  ;;  %p1749_p5 = scmp.ne.s32.totalorder (!%p128_p3), %s1859_s9, 0 }
   0x7   : > { %131 = sbr.rel (%p128_p3) target bundleno = 468 (0x1d4), region = 28  ;;  %p162_p4 = scmp.lt.s32.totalorder (!%p128_p3), %s1746_s13, 127 }
   0xc   : > { %s3018_s13 = smov (!%p162_p4, %s1746_s13), 127  ;;  %175 = sbr.rel (%p1749_p5) target bundleno = 396 (0x18c), region = 32 }
   0xd   : > { %s1817_s14 = sshll.u32 %s3018_s13, 4 }
   0xe   : > { %s1909_s17 = scalar_lea.vmem %s3012_s2, %s1817_s14 }
  0x11   : > { %v178_v0 = vld [vmem:[%s3010_s0 + $0x10] sm:$0xff]  ;;  %v176_v1 = vld [vmem:[%s3010_s0] sm:$0xff]  ;;  %v1869_v2 = vmov 0   ;;  %v179_v3 = vld [vmem:[%s3010_s0 + $0x18] sm:$0xff]  ;;  %vm944_vm0 = vcmask 130048  }
  0x12   : > { %1844 = vset.pattern.permute.xlu1 %v1869_v2  ;;  %1843 = vset.pattern.permute.xlu0 %v1869_v2  ;;  %v177_v4 = vld [vmem:[%s3010_s0 + $0x8] sm:$0xff]  ;;  %v180_v6 = vld [vmem:[%s3010_s0 + $0x20] sm:$0xff]  ;;  %v183_v7 = vld [vmem:[%s3010_s0 + $0x38] sm:$0xff] }
  0x13   : > { %316 = vperm.xlu1 %1844, %v178_v0   ;;  %306 = vperm.xlu0 %1843, %v176_v1   ;;  %v181_v5 = vld [vmem:[%s3010_s0 + $0x28] sm:$0xff]  ;;  %v182_v8 = vld [vmem:[%s3010_s0 + $0x30] sm:$0xff]  ;;  %v184_v10 = vld [vmem:[%s3010_s0 + $0x40] sm:$0xff] }
  0x14   : > { %v185_v9 = vld [vmem:[%s3010_s0 + $0x48] sm:$0xff]  ;;  %v187_v11 = vld [vmem:[%s3010_s0 + $0x58] sm:$0xff]  ;;  %v186_v12 = vld [vmem:[%s3010_s0 + $0x50] sm:$0xff] }
  0x15   : > { %v189_v13 = vld [vmem:[%s3010_s0 + $0x68] sm:$0xff]  ;;  %v188_v14 = vld [vmem:[%s3010_s0 + $0x60] sm:$0xff]  ;;  %v191_v15 = vld [vmem:[%s3010_s0 + $0x78] sm:$0xff] }
  0x16   : > { %v190_v16 = vld [vmem:[%s3010_s0 + $0x70] sm:$0xff]  ;;  %v193_v17 = vld [vmem:[%s3010_s0 + $0x88] sm:$0xff]  ;;  %v192_v18 = vld [vmem:[%s3010_s0 + $0x80] sm:$0xff] }
  0x17   : > { %321 = vperm.xlu1 %1844, %v179_v3   ;;  %311 = vperm.xlu0 %1843, %v177_v4   ;;  %v195_v19 = vld [vmem:[%s3010_s0 + $0x98] sm:$0xff]  ;;  %v194_v20 = vld [vmem:[%s3010_s0 + $0x90] sm:$0xff]  ;;  %v197_v21 = vld [vmem:[%s3010_s0 + $0xa8] sm:$0xff] }
  0x18   : > { %v196_v22 = vld [vmem:[%s3010_s0 + $0xa0] sm:$0xff]  ;;  %v199_v23 = vld [vmem:[%s3010_s0 + $0xb8] sm:$0xff]  ;;  %v198_v24 = vld [vmem:[%s3010_s0 + $0xb0] sm:$0xff] }
  0x19   : > { %v201_v25 = vld [vmem:[%s3010_s0 + $0xc8] sm:$0xff]  ;;  %v200_v26 = vld [vmem:[%s3010_s0 + $0xc0] sm:$0xff]  ;;  %v203_v27 = vld [vmem:[%s3010_s0 + $0xd8] sm:$0xff] }
  0x1a   : > { %v202_v28 = vld [vmem:[%s3010_s0 + $0xd0] sm:$0xff]  ;;  %v205_v29 = vld [vmem:[%s3010_s0 + $0xe8] sm:$0xff]  ;;  %v204_v30 = vld [vmem:[%s3010_s0 + $0xe0] sm:$0xff] }
  0x1b   : > { %331 = vperm.xlu1 %1844, %v181_v5   ;;  %326 = vperm.xlu0 %1843, %v180_v6   ;;  %v207_v31 = vld [vmem:[%s3010_s0 + $0xf8] sm:$0xff]  ;;  %v206_v32 = vld [vmem:[%s3010_s0 + $0xf0] sm:$0xff]  ;;  %v209_v33 = vld [vmem:[%s3010_s0 + $0x108] sm:$0xff] }
  0x1c   : > { %v208_v34 = vld [vmem:[%s3010_s0 + $0x100] sm:$0xff]  ;;  %v211_v35 = vld [vmem:[%s3010_s0 + $0x118] sm:$0xff]  ;;  %v210_v36 = vld [vmem:[%s3010_s0 + $0x110] sm:$0xff] }
  0x1d   : > { %v213_v37 = vld [vmem:[%s3010_s0 + $0x128] sm:$0xff]  ;;  %v212_v38 = vld [vmem:[%s3010_s0 + $0x120] sm:$0xff]  ;;  %v215_v39 = vld [vmem:[%s3010_s0 + $0x138] sm:$0xff] }
  0x1e   : > { %v214_v40 = vld [vmem:[%s3010_s0 + $0x130] sm:$0xff]  ;;  %v217_v41 = vld [vmem:[%s3010_s0 + $0x148] sm:$0xff]  ;;  %v216_v42 = vld [vmem:[%s3010_s0 + $0x140] sm:$0xff] }
  0x1f   : > { %341 = vperm.xlu1 %1844, %v183_v7   ;;  %336 = vperm.xlu0 %1843, %v182_v8   ;;  %v219_v43 = vld [vmem:[%s3010_s0 + $0x158] sm:$0xff]  ;;  %v218_v44 = vld [vmem:[%s3010_s0 + $0x150] sm:$0xff]  ;;  %v221_v45 = vld [vmem:[%s3010_s0 + $0x168] sm:$0xff] }
  0x20   : > { %v220_v46 = vld [vmem:[%s3010_s0 + $0x160] sm:$0xff]  ;;  %v223_v47 = vld [vmem:[%s3010_s0 + $0x178] sm:$0xff]  ;;  %v222_v48 = vld [vmem:[%s3010_s0 + $0x170] sm:$0xff] }
  0x21   : > { %v225_v49 = vld [vmem:[%s3010_s0 + $0x188] sm:$0xff]  ;;  %v224_v50 = vld [vmem:[%s3010_s0 + $0x180] sm:$0xff]  ;;  %v227_v51 = vld [vmem:[%s3010_s0 + $0x198] sm:$0xff] }
  0x22   : > { %v226_v52 = vld [vmem:[%s3010_s0 + $0x190] sm:$0xff]  ;;  %v229_v53 = vld [vmem:[%s3010_s0 + $0x1a8] sm:$0xff]  ;;  %v228_v54 = vld [vmem:[%s3010_s0 + $0x1a0] sm:$0xff] }
  0x23   : > { %351 = vperm.xlu1 %1844, %v185_v9   ;;  %346 = vperm.xlu0 %1843, %v184_v10   ;;  %v231_v55 = vld [vmem:[%s3010_s0 + $0x1b8] sm:$0xff]  ;;  %v230_v56 = vld [vmem:[%s3010_s0 + $0x1b0] sm:$0xff]  ;;  %v233_v57 = vld [vmem:[%s3010_s0 + $0x1c8] sm:$0xff] }
  0x24   : > { %v232_v58 = vld [vmem:[%s3010_s0 + $0x1c0] sm:$0xff]  ;;  %v235_v59 = vld [vmem:[%s3010_s0 + $0x1d8] sm:$0xff]  ;;  %v234_v60 = vld [vmem:[%s3010_s0 + $0x1d0] sm:$0xff] }
  0x25   : > { %v237_v61 = vld [vmem:[%s3010_s0 + $0x1e8] sm:$0xff]  ;;  %v236_v62 = vld [vmem:[%s3010_s0 + $0x1e0] sm:$0xff]  ;;  %v239_v63 = vld [vmem:[%s3010_s0 + $0x1f8] sm:$0xff] }
  0x26   : > { %v238_v0 = vld [vmem:[%s3010_s0 + $0x1f0] sm:$0xff]  ;;  %v241_v3 = vld [vmem:[%s3010_s0 + $0x208] sm:$0xff]  ;;  %v240_v4 = vld [vmem:[%s3010_s0 + $0x200] sm:$0xff] }
  0x27   : > { %361 = vperm.xlu1 %1844, %v187_v11   ;;  %356 = vperm.xlu0 %1843, %v186_v12   ;;  %v243_v7 = vld [vmem:[%s3010_s0 + $0x218] sm:$0xff]  ;;  %v242_v8 = vld [vmem:[%s3010_s0 + $0x210] sm:$0xff]  ;;  %v245_v11 = vld [vmem:[%s3010_s0 + $0x228] sm:$0xff] }
  0x28   : > { %v244_v12 = vld [vmem:[%s3010_s0 + $0x220] sm:$0xff] }
  0x2b   : > { %371 = vperm.xlu1 %1844, %v189_v13   ;;  %366 = vperm.xlu0 %1843, %v188_v14  }
  0x2f   : > { %381 = vperm.xlu1 %1844, %v191_v15   ;;  %376 = vperm.xlu0 %1843, %v190_v16   ;;  %v247_v15 = vld [vmem:[%s3010_s0 + $0x238] sm:$0xff]  ;;  %v246_v16 = vld [vmem:[%s3010_s0 + $0x230] sm:$0xff] }
  0x33   : > { %391 = vperm.xlu1 %1844, %v193_v17   ;;  %386 = vperm.xlu0 %1843, %v192_v18  }
  0x37   : > { %401 = vperm.xlu1 %1844, %v195_v19   ;;  %396 = vperm.xlu0 %1843, %v194_v20   ;;  %v249_v19 = vld [vmem:[%s3010_s0 + $0x248] sm:$0xff]  ;;  %v248_v20 = vld [vmem:[%s3010_s0 + $0x240] sm:$0xff] }
  0x3b   : > { %411 = vperm.xlu1 %1844, %v197_v21   ;;  %406 = vperm.xlu0 %1843, %v196_v22  }
  0x3f   : > { %421 = vperm.xlu1 %1844, %v199_v23   ;;  %416 = vperm.xlu0 %1843, %v198_v24   ;;  %v251_v23 = vld [vmem:[%s3010_s0 + $0x258] sm:$0xff]  ;;  %v250_v24 = vld [vmem:[%s3010_s0 + $0x250] sm:$0xff] }
  0x43   : > { %431 = vperm.xlu1 %1844, %v201_v25   ;;  %426 = vperm.xlu0 %1843, %v200_v26  }
  0x47   : > { %441 = vperm.xlu1 %1844, %v203_v27   ;;  %436 = vperm.xlu0 %1843, %v202_v28   ;;  %v253_v27 = vld [vmem:[%s3010_s0 + $0x268] sm:$0xff]  ;;  %v252_v28 = vld [vmem:[%s3010_s0 + $0x260] sm:$0xff] }
  0x4b   : > { %451 = vperm.xlu1 %1844, %v205_v29   ;;  %446 = vperm.xlu0 %1843, %v204_v30  }
  0x4f   : > { %461 = vperm.xlu1 %1844, %v207_v31   ;;  %456 = vperm.xlu0 %1843, %v206_v32   ;;  %v255_v31 = vld [vmem:[%s3010_s0 + $0x278] sm:$0xff]  ;;  %v254_v32 = vld [vmem:[%s3010_s0 + $0x270] sm:$0xff] }
  0x53   : > { %471 = vperm.xlu1 %1844, %v209_v33   ;;  %466 = vperm.xlu0 %1843, %v208_v34  }
  0x57   : > { %481 = vperm.xlu1 %1844, %v211_v35   ;;  %476 = vperm.xlu0 %1843, %v210_v36   ;;  %v257_v35 = vld [vmem:[%s3010_s0 + $0x288] sm:$0xff]  ;;  %v256_v36 = vld [vmem:[%s3010_s0 + $0x280] sm:$0xff] }
  0x5b   : > { %491 = vperm.xlu1 %1844, %v213_v37   ;;  %486 = vperm.xlu0 %1843, %v212_v38  }
  0x5f   : > { %501 = vperm.xlu1 %1844, %v215_v39   ;;  %496 = vperm.xlu0 %1843, %v214_v40   ;;  %v259_v39 = vld [vmem:[%s3010_s0 + $0x298] sm:$0xff]  ;;  %v258_v40 = vld [vmem:[%s3010_s0 + $0x290] sm:$0xff] }
  0x63   : > { %511 = vperm.xlu1 %1844, %v217_v41   ;;  %506 = vperm.xlu0 %1843, %v216_v42  }
  0x67   : > { %521 = vperm.xlu1 %1844, %v219_v43   ;;  %516 = vperm.xlu0 %1843, %v218_v44   ;;  %v261_v43 = vld [vmem:[%s3010_s0 + $0x2a8] sm:$0xff]  ;;  %v260_v44 = vld [vmem:[%s3010_s0 + $0x2a0] sm:$0xff] }
  0x6b   : > { %531 = vperm.xlu1 %1844, %v221_v45   ;;  %526 = vperm.xlu0 %1843, %v220_v46  }
  0x6f   : > { %541 = vperm.xlu1 %1844, %v223_v47   ;;  %536 = vperm.xlu0 %1843, %v222_v48   ;;  %v263_v47 = vld [vmem:[%s3010_s0 + $0x2b8] sm:$0xff]  ;;  %v262_v48 = vld [vmem:[%s3010_s0 + $0x2b0] sm:$0xff] }
  0x73   : > { %551 = vperm.xlu1 %1844, %v225_v49   ;;  %546 = vperm.xlu0 %1843, %v224_v50  }
  0x77   : > { %561 = vperm.xlu1 %1844, %v227_v51   ;;  %556 = vperm.xlu0 %1843, %v226_v52   ;;  %v265_v51 = vld [vmem:[%s3010_s0 + $0x2c8] sm:$0xff]  ;;  %v264_v52 = vld [vmem:[%s3010_s0 + $0x2c0] sm:$0xff] }
  0x7b   : > { %571 = vperm.xlu1 %1844, %v229_v53   ;;  %566 = vperm.xlu0 %1843, %v228_v54  }
  0x7f   : > { %581 = vperm.xlu1 %1844, %v231_v55   ;;  %576 = vperm.xlu0 %1843, %v230_v56   ;;  %v267_v55 = vld [vmem:[%s3010_s0 + $0x2d8] sm:$0xff]  ;;  %v266_v56 = vld [vmem:[%s3010_s0 + $0x2d0] sm:$0xff] }
  0x83   : > { %591 = vperm.xlu1 %1844, %v233_v57   ;;  %586 = vperm.xlu0 %1843, %v232_v58  }
  0x87   : > { %601 = vperm.xlu1 %1844, %v235_v59   ;;  %596 = vperm.xlu0 %1843, %v234_v60   ;;  %v269_v59 = vld [vmem:[%s3010_s0 + $0x2e8] sm:$0xff]  ;;  %v268_v60 = vld [vmem:[%s3010_s0 + $0x2e0] sm:$0xff] }
  0x8b   : > { %611 = vperm.xlu1 %1844, %v237_v61   ;;  %606 = vperm.xlu0 %1843, %v236_v62  }
  0x8e   : > { %v317_v1 = vpop.permute.xlu1 %316  ;;  %v307_v2 = vpop.permute.xlu0 %306 }
  0x8f   : > { %947 = vst.msk [vmem:[%s1909_s17 + $0x10] sm:$0xff] %vm944_vm0, %v317_v1  ;;  %945 = vst.msk [vmem:[%s1909_s17] sm:$0xff] %vm944_vm0, %v307_v2  ;;  %621 = vperm.xlu1 %1844, %v239_v63   ;;  %616 = vperm.xlu0 %1843, %v238_v0   ;;  %v271_v63 = vld [vmem:[%s3010_s0 + $0x2f8] sm:$0xff]  ;;  %v270_v0 = vld [vmem:[%s3010_s0 + $0x2f0] sm:$0xff] }
  0x92   : > { %v322_v5 = vpop.permute.xlu1 %321  ;;  %v312_v6 = vpop.permute.xlu0 %311 }
  0x93   : > { %948 = vst.msk [vmem:[%s1909_s17 + $0x18] sm:$0xff] %vm944_vm0, %v322_v5  ;;  %946 = vst.msk [vmem:[%s1909_s17 + $0x8] sm:$0xff] %vm944_vm0, %v312_v6  ;;  %631 = vperm.xlu1 %1844, %v241_v3   ;;  %626 = vperm.xlu0 %1843, %v240_v4   ;;  %v273_v3 = vld [vmem:[%s3010_s0 + $0x308] sm:$0xff]  ;;  %v272_v4 = vld [vmem:[%s3010_s0 + $0x300] sm:$0xff] }
  0x96   : > { %v332_v9 = vpop.permute.xlu1 %331  ;;  %v327_v10 = vpop.permute.xlu0 %326 }
  0x97   : > { %950 = vst.msk [vmem:[%s1909_s17 + $0x28] sm:$0xff] %vm944_vm0, %v332_v9  ;;  %949 = vst.msk [vmem:[%s1909_s17 + $0x20] sm:$0xff] %vm944_vm0, %v327_v10  ;;  %641 = vperm.xlu1 %1844, %v243_v7   ;;  %636 = vperm.xlu0 %1843, %v242_v8   ;;  %v275_v7 = vld [vmem:[%s3010_s0 + $0x318] sm:$0xff]  ;;  %v274_v8 = vld [vmem:[%s3010_s0 + $0x310] sm:$0xff] }
  0x9a   : > { %v342_v13 = vpop.permute.xlu1 %341  ;;  %v337_v14 = vpop.permute.xlu0 %336 }
  0x9b   : > { %952 = vst.msk [vmem:[%s1909_s17 + $0x38] sm:$0xff] %vm944_vm0, %v342_v13  ;;  %951 = vst.msk [vmem:[%s1909_s17 + $0x30] sm:$0xff] %vm944_vm0, %v337_v14  ;;  %651 = vperm.xlu1 %1844, %v245_v11   ;;  %646 = vperm.xlu0 %1843, %v244_v12   ;;  %v277_v11 = vld [vmem:[%s3010_s0 + $0x328] sm:$0xff]  ;;  %v276_v12 = vld [vmem:[%s3010_s0 + $0x320] sm:$0xff] }
  0x9e   : > { %v352_v17 = vpop.permute.xlu1 %351  ;;  %v347_v18 = vpop.permute.xlu0 %346 }
  0x9f   : > { %954 = vst.msk [vmem:[%s1909_s17 + $0x48] sm:$0xff] %vm944_vm0, %v352_v17  ;;  %953 = vst.msk [vmem:[%s1909_s17 + $0x40] sm:$0xff] %vm944_vm0, %v347_v18  ;;  %661 = vperm.xlu1 %1844, %v247_v15   ;;  %656 = vperm.xlu0 %1843, %v246_v16   ;;  %v279_v15 = vld [vmem:[%s3010_s0 + $0x338] sm:$0xff]  ;;  %v278_v16 = vld [vmem:[%s3010_s0 + $0x330] sm:$0xff] }
  0xa2   : > { %v362_v21 = vpop.permute.xlu1 %361  ;;  %v357_v22 = vpop.permute.xlu0 %356 }
  0xa3   : > { %956 = vst.msk [vmem:[%s1909_s17 + $0x58] sm:$0xff] %vm944_vm0, %v362_v21  ;;  %955 = vst.msk [vmem:[%s1909_s17 + $0x50] sm:$0xff] %vm944_vm0, %v357_v22  ;;  %671 = vperm.xlu1 %1844, %v249_v19   ;;  %666 = vperm.xlu0 %1843, %v248_v20   ;;  %v281_v19 = vld [vmem:[%s3010_s0 + $0x348] sm:$0xff]  ;;  %v280_v20 = vld [vmem:[%s3010_s0 + $0x340] sm:$0xff] }
  0xa6   : > { %v372_v25 = vpop.permute.xlu1 %371  ;;  %v367_v26 = vpop.permute.xlu0 %366 }
  0xa7   : > { %958 = vst.msk [vmem:[%s1909_s17 + $0x68] sm:$0xff] %vm944_vm0, %v372_v25  ;;  %957 = vst.msk [vmem:[%s1909_s17 + $0x60] sm:$0xff] %vm944_vm0, %v367_v26  ;;  %681 = vperm.xlu1 %1844, %v251_v23   ;;  %676 = vperm.xlu0 %1843, %v250_v24   ;;  %v283_v23 = vld [vmem:[%s3010_s0 + $0x358] sm:$0xff]  ;;  %v282_v24 = vld [vmem:[%s3010_s0 + $0x350] sm:$0xff] }
  0xaa   : > { %v382_v29 = vpop.permute.xlu1 %381  ;;  %v377_v30 = vpop.permute.xlu0 %376 }
  0xab   : > { %960 = vst.msk [vmem:[%s1909_s17 + $0x78] sm:$0xff] %vm944_vm0, %v382_v29  ;;  %959 = vst.msk [vmem:[%s1909_s17 + $0x70] sm:$0xff] %vm944_vm0, %v377_v30  ;;  %691 = vperm.xlu1 %1844, %v253_v27   ;;  %686 = vperm.xlu0 %1843, %v252_v28   ;;  %v285_v27 = vld [vmem:[%s3010_s0 + $0x368] sm:$0xff]  ;;  %v284_v28 = vld [vmem:[%s3010_s0 + $0x360] sm:$0xff] }
  0xae   : > { %v392_v33 = vpop.permute.xlu1 %391  ;;  %v387_v34 = vpop.permute.xlu0 %386 }
  0xaf   : > { %962 = vst.msk [vmem:[%s1909_s17 + $0x88] sm:$0xff] %vm944_vm0, %v392_v33  ;;  %961 = vst.msk [vmem:[%s1909_s17 + $0x80] sm:$0xff] %vm944_vm0, %v387_v34  ;;  %701 = vperm.xlu1 %1844, %v255_v31   ;;  %696 = vperm.xlu0 %1843, %v254_v32   ;;  %v287_v31 = vld [vmem:[%s3010_s0 + $0x378] sm:$0xff]  ;;  %v286_v32 = vld [vmem:[%s3010_s0 + $0x370] sm:$0xff] }
  0xb2   : > { %v402_v37 = vpop.permute.xlu1 %401  ;;  %v397_v38 = vpop.permute.xlu0 %396 }
  0xb3   : > { %964 = vst.msk [vmem:[%s1909_s17 + $0x98] sm:$0xff] %vm944_vm0, %v402_v37  ;;  %963 = vst.msk [vmem:[%s1909_s17 + $0x90] sm:$0xff] %vm944_vm0, %v397_v38  ;;  %711 = vperm.xlu1 %1844, %v257_v35   ;;  %706 = vperm.xlu0 %1843, %v256_v36   ;;  %v289_v35 = vld [vmem:[%s3010_s0 + $0x388] sm:$0xff]  ;;  %v288_v36 = vld [vmem:[%s3010_s0 + $0x380] sm:$0xff] }
  0xb6   : > { %v412_v41 = vpop.permute.xlu1 %411  ;;  %v407_v42 = vpop.permute.xlu0 %406 }
  0xb7   : > { %966 = vst.msk [vmem:[%s1909_s17 + $0xa8] sm:$0xff] %vm944_vm0, %v412_v41  ;;  %965 = vst.msk [vmem:[%s1909_s17 + $0xa0] sm:$0xff] %vm944_vm0, %v407_v42  ;;  %721 = vperm.xlu1 %1844, %v259_v39   ;;  %716 = vperm.xlu0 %1843, %v258_v40   ;;  %v291_v39 = vld [vmem:[%s3010_s0 + $0x398] sm:$0xff]  ;;  %v290_v40 = vld [vmem:[%s3010_s0 + $0x390] sm:$0xff] }
  0xba   : > { %v422_v45 = vpop.permute.xlu1 %421  ;;  %v417_v46 = vpop.permute.xlu0 %416 }
  0xbb   : > { %968 = vst.msk [vmem:[%s1909_s17 + $0xb8] sm:$0xff] %vm944_vm0, %v422_v45  ;;  %967 = vst.msk [vmem:[%s1909_s17 + $0xb0] sm:$0xff] %vm944_vm0, %v417_v46  ;;  %731 = vperm.xlu1 %1844, %v261_v43   ;;  %726 = vperm.xlu0 %1843, %v260_v44   ;;  %v293_v43 = vld [vmem:[%s3010_s0 + $0x3a8] sm:$0xff]  ;;  %v292_v44 = vld [vmem:[%s3010_s0 + $0x3a0] sm:$0xff] }
  0xbe   : > { %v432_v49 = vpop.permute.xlu1 %431  ;;  %v427_v50 = vpop.permute.xlu0 %426 }
  0xbf   : > { %970 = vst.msk [vmem:[%s1909_s17 + $0xc8] sm:$0xff] %vm944_vm0, %v432_v49  ;;  %969 = vst.msk [vmem:[%s1909_s17 + $0xc0] sm:$0xff] %vm944_vm0, %v427_v50  ;;  %741 = vperm.xlu1 %1844, %v263_v47   ;;  %736 = vperm.xlu0 %1843, %v262_v48   ;;  %v295_v47 = vld [vmem:[%s3010_s0 + $0x3b8] sm:$0xff]  ;;  %v294_v48 = vld [vmem:[%s3010_s0 + $0x3b0] sm:$0xff] }
  0xc2   : > { %v442_v53 = vpop.permute.xlu1 %441  ;;  %v437_v54 = vpop.permute.xlu0 %436 }
  0xc3   : > { %972 = vst.msk [vmem:[%s1909_s17 + $0xd8] sm:$0xff] %vm944_vm0, %v442_v53  ;;  %971 = vst.msk [vmem:[%s1909_s17 + $0xd0] sm:$0xff] %vm944_vm0, %v437_v54  ;;  %751 = vperm.xlu1 %1844, %v265_v51   ;;  %746 = vperm.xlu0 %1843, %v264_v52   ;;  %v297_v51 = vld [vmem:[%s3010_s0 + $0x3c8] sm:$0xff]  ;;  %v296_v52 = vld [vmem:[%s3010_s0 + $0x3c0] sm:$0xff] }
  0xc6   : > { %v452_v57 = vpop.permute.xlu1 %451  ;;  %v447_v58 = vpop.permute.xlu0 %446 }
  0xc7   : > { %974 = vst.msk [vmem:[%s1909_s17 + $0xe8] sm:$0xff] %vm944_vm0, %v452_v57  ;;  %973 = vst.msk [vmem:[%s1909_s17 + $0xe0] sm:$0xff] %vm944_vm0, %v447_v58  ;;  %761 = vperm.xlu1 %1844, %v267_v55   ;;  %756 = vperm.xlu0 %1843, %v266_v56   ;;  %v299_v55 = vld [vmem:[%s3010_s0 + $0x3d8] sm:$0xff]  ;;  %v298_v56 = vld [vmem:[%s3010_s0 + $0x3d0] sm:$0xff] }
  0xca   : > { %v462_v61 = vpop.permute.xlu1 %461  ;;  %v457_v62 = vpop.permute.xlu0 %456 }
  0xcb   : > { %976 = vst.msk [vmem:[%s1909_s17 + $0xf8] sm:$0xff] %vm944_vm0, %v462_v61  ;;  %975 = vst.msk [vmem:[%s1909_s17 + $0xf0] sm:$0xff] %vm944_vm0, %v457_v62  ;;  %771 = vperm.xlu1 %1844, %v269_v59   ;;  %766 = vperm.xlu0 %1843, %v268_v60   ;;  %v301_v59 = vld [vmem:[%s3010_s0 + $0x3e8] sm:$0xff]  ;;  %v300_v60 = vld [vmem:[%s3010_s0 + $0x3e0] sm:$0xff] }
  0xce   : > { %v472_v1 = vpop.permute.xlu1 %471  ;;  %v467_v2 = vpop.permute.xlu0 %466 }
  0xcf   : > { %978 = vst.msk [vmem:[%s1909_s17 + $0x108] sm:$0xff] %vm944_vm0, %v472_v1  ;;  %977 = vst.msk [vmem:[%s1909_s17 + $0x100] sm:$0xff] %vm944_vm0, %v467_v2  ;;  %781 = vperm.xlu1 %1844, %v271_v63   ;;  %776 = vperm.xlu0 %1843, %v270_v0   ;;  %v303_v63 = vld [vmem:[%s3010_s0 + $0x3f8] sm:$0xff]  ;;  %v302_v0 = vld [vmem:[%s3010_s0 + $0x3f0] sm:$0xff] }
  0xd2   : > { %v482_v5 = vpop.permute.xlu1 %481  ;;  %v477_v6 = vpop.permute.xlu0 %476 }
  0xd3   : > { %980 = vst.msk [vmem:[%s1909_s17 + $0x118] sm:$0xff] %vm944_vm0, %v482_v5  ;;  %979 = vst.msk [vmem:[%s1909_s17 + $0x110] sm:$0xff] %vm944_vm0, %v477_v6  ;;  %791 = vperm.xlu1 %1844, %v273_v3   ;;  %786 = vperm.xlu0 %1843, %v272_v4  }
  0xd6   : > { %v492_v9 = vpop.permute.xlu1 %491  ;;  %v487_v10 = vpop.permute.xlu0 %486 }
  0xd7   : > { %982 = vst.msk [vmem:[%s1909_s17 + $0x128] sm:$0xff] %vm944_vm0, %v492_v9  ;;  %981 = vst.msk [vmem:[%s1909_s17 + $0x120] sm:$0xff] %vm944_vm0, %v487_v10  ;;  %801 = vperm.xlu1 %1844, %v275_v7   ;;  %796 = vperm.xlu0 %1843, %v274_v8  }
  0xda   : > { %v502_v13 = vpop.permute.xlu1 %501  ;;  %v497_v14 = vpop.permute.xlu0 %496 }
  0xdb   : > { %984 = vst.msk [vmem:[%s1909_s17 + $0x138] sm:$0xff] %vm944_vm0, %v502_v13  ;;  %983 = vst.msk [vmem:[%s1909_s17 + $0x130] sm:$0xff] %vm944_vm0, %v497_v14  ;;  %811 = vperm.xlu1 %1844, %v277_v11   ;;  %806 = vperm.xlu0 %1843, %v276_v12  }
  0xde   : > { %v512_v17 = vpop.permute.xlu1 %511  ;;  %v507_v18 = vpop.permute.xlu0 %506 }
  0xdf   : > { %986 = vst.msk [vmem:[%s1909_s17 + $0x148] sm:$0xff] %vm944_vm0, %v512_v17  ;;  %985 = vst.msk [vmem:[%s1909_s17 + $0x140] sm:$0xff] %vm944_vm0, %v507_v18  ;;  %821 = vperm.xlu1 %1844, %v279_v15   ;;  %816 = vperm.xlu0 %1843, %v278_v16  }
  0xe2   : > { %v522_v21 = vpop.permute.xlu1 %521  ;;  %v517_v22 = vpop.permute.xlu0 %516 }
  0xe3   : > { %988 = vst.msk [vmem:[%s1909_s17 + $0x158] sm:$0xff] %vm944_vm0, %v522_v21  ;;  %987 = vst.msk [vmem:[%s1909_s17 + $0x150] sm:$0xff] %vm944_vm0, %v517_v22  ;;  %831 = vperm.xlu1 %1844, %v281_v19   ;;  %826 = vperm.xlu0 %1843, %v280_v20  }
  0xe6   : > { %v532_v25 = vpop.permute.xlu1 %531  ;;  %v527_v26 = vpop.permute.xlu0 %526 }
  0xe7   : > { %990 = vst.msk [vmem:[%s1909_s17 + $0x168] sm:$0xff] %vm944_vm0, %v532_v25  ;;  %989 = vst.msk [vmem:[%s1909_s17 + $0x160] sm:$0xff] %vm944_vm0, %v527_v26  ;;  %841 = vperm.xlu1 %1844, %v283_v23   ;;  %836 = vperm.xlu0 %1843, %v282_v24  }
  0xea   : > { %v542_v29 = vpop.permute.xlu1 %541  ;;  %v537_v30 = vpop.permute.xlu0 %536 }
  0xeb   : > { %992 = vst.msk [vmem:[%s1909_s17 + $0x178] sm:$0xff] %vm944_vm0, %v542_v29  ;;  %991 = vst.msk [vmem:[%s1909_s17 + $0x170] sm:$0xff] %vm944_vm0, %v537_v30  ;;  %851 = vperm.xlu1 %1844, %v285_v27   ;;  %846 = vperm.xlu0 %1843, %v284_v28  }
  0xee   : > { %v552_v33 = vpop.permute.xlu1 %551  ;;  %v547_v34 = vpop.permute.xlu0 %546 }
  0xef   : > { %994 = vst.msk [vmem:[%s1909_s17 + $0x188] sm:$0xff] %vm944_vm0, %v552_v33  ;;  %993 = vst.msk [vmem:[%s1909_s17 + $0x180] sm:$0xff] %vm944_vm0, %v547_v34  ;;  %861 = vperm.xlu1 %1844, %v287_v31   ;;  %856 = vperm.xlu0 %1843, %v286_v32  }
  0xf2   : > { %v562_v37 = vpop.permute.xlu1 %561  ;;  %v557_v38 = vpop.permute.xlu0 %556 }
  0xf3   : > { %996 = vst.msk [vmem:[%s1909_s17 + $0x198] sm:$0xff] %vm944_vm0, %v562_v37  ;;  %995 = vst.msk [vmem:[%s1909_s17 + $0x190] sm:$0xff] %vm944_vm0, %v557_v38  ;;  %871 = vperm.xlu1 %1844, %v289_v35   ;;  %866 = vperm.xlu0 %1843, %v288_v36  }
  0xf6   : > { %v572_v41 = vpop.permute.xlu1 %571  ;;  %v567_v42 = vpop.permute.xlu0 %566 }
  0xf7   : > { %998 = vst.msk [vmem:[%s1909_s17 + $0x1a8] sm:$0xff] %vm944_vm0, %v572_v41  ;;  %997 = vst.msk [vmem:[%s1909_s17 + $0x1a0] sm:$0xff] %vm944_vm0, %v567_v42  ;;  %881 = vperm.xlu1 %1844, %v291_v39   ;;  %876 = vperm.xlu0 %1843, %v290_v40  }
  0xfa   : > { %v582_v45 = vpop.permute.xlu1 %581  ;;  %v577_v46 = vpop.permute.xlu0 %576 }
  0xfb   : > { %1000 = vst.msk [vmem:[%s1909_s17 + $0x1b8] sm:$0xff] %vm944_vm0, %v582_v45  ;;  %999 = vst.msk [vmem:[%s1909_s17 + $0x1b0] sm:$0xff] %vm944_vm0, %v577_v46  ;;  %891 = vperm.xlu1 %1844, %v293_v43   ;;  %886 = vperm.xlu0 %1843, %v292_v44  }
  0xfe   : > { %v592_v49 = vpop.permute.xlu1 %591  ;;  %v587_v50 = vpop.permute.xlu0 %586 }
  0xff   : > { %1002 = vst.msk [vmem:[%s1909_s17 + $0x1c8] sm:$0xff] %vm944_vm0, %v592_v49  ;;  %1001 = vst.msk [vmem:[%s1909_s17 + $0x1c0] sm:$0xff] %vm944_vm0, %v587_v50  ;;  %901 = vperm.xlu1 %1844, %v295_v47   ;;  %896 = vperm.xlu0 %1843, %v294_v48  }
 0x102   : > { %v602_v53 = vpop.permute.xlu1 %601  ;;  %v597_v54 = vpop.permute.xlu0 %596 }
 0x103   : > { %1004 = vst.msk [vmem:[%s1909_s17 + $0x1d8] sm:$0xff] %vm944_vm0, %v602_v53  ;;  %1003 = vst.msk [vmem:[%s1909_s17 + $0x1d0] sm:$0xff] %vm944_vm0, %v597_v54  ;;  %911 = vperm.xlu1 %1844, %v297_v51   ;;  %906 = vperm.xlu0 %1843, %v296_v52  }
 0x106   : > { %v612_v57 = vpop.permute.xlu1 %611  ;;  %v607_v58 = vpop.permute.xlu0 %606 }
 0x107   : > { %1006 = vst.msk [vmem:[%s1909_s17 + $0x1e8] sm:$0xff] %vm944_vm0, %v612_v57  ;;  %1005 = vst.msk [vmem:[%s1909_s17 + $0x1e0] sm:$0xff] %vm944_vm0, %v607_v58  ;;  %921 = vperm.xlu1 %1844, %v299_v55   ;;  %916 = vperm.xlu0 %1843, %v298_v56  }
 0x10a   : > { %v622_v61 = vpop.permute.xlu1 %621  ;;  %v617_v62 = vpop.permute.xlu0 %616 }
 0x10b   : > { %1008 = vst.msk [vmem:[%s1909_s17 + $0x1f8] sm:$0xff] %vm944_vm0, %v622_v61  ;;  %1007 = vst.msk [vmem:[%s1909_s17 + $0x1f0] sm:$0xff] %vm944_vm0, %v617_v62  ;;  %931 = vperm.xlu1 %1844, %v301_v59   ;;  %926 = vperm.xlu0 %1843, %v300_v60  }
 0x10e   : > { %v632_v1 = vpop.permute.xlu1 %631  ;;  %v627_v2 = vpop.permute.xlu0 %626 }
 0x10f   : > { %1010 = vst.msk [vmem:[%s1909_s17 + $0x208] sm:$0xff] %vm944_vm0, %v632_v1  ;;  %1009 = vst.msk [vmem:[%s1909_s17 + $0x200] sm:$0xff] %vm944_vm0, %v627_v2  ;;  %941 = vperm.xlu1 %1844, %v303_v63   ;;  %936 = vperm.xlu0 %1843, %v302_v0  }
 0x112   : > { %v642_v3 = vpop.permute.xlu1 %641  ;;  %v637_v4 = vpop.permute.xlu0 %636 }
 0x113   : > { %1012 = vst.msk [vmem:[%s1909_s17 + $0x218] sm:$0xff] %vm944_vm0, %v642_v3  ;;  %1011 = vst.msk [vmem:[%s1909_s17 + $0x210] sm:$0xff] %vm944_vm0, %v637_v4 }
 0x116   : > { %v652_v5 = vpop.permute.xlu1 %651  ;;  %v647_v6 = vpop.permute.xlu0 %646 }
 0x117   : > { %1014 = vst.msk [vmem:[%s1909_s17 + $0x228] sm:$0xff] %vm944_vm0, %v652_v5  ;;  %1013 = vst.msk [vmem:[%s1909_s17 + $0x220] sm:$0xff] %vm944_vm0, %v647_v6 }
 0x11a   : > { %v662_v7 = vpop.permute.xlu1 %661  ;;  %v657_v8 = vpop.permute.xlu0 %656 }
 0x11b   : > { %1016 = vst.msk [vmem:[%s1909_s17 + $0x238] sm:$0xff] %vm944_vm0, %v662_v7  ;;  %1015 = vst.msk [vmem:[%s1909_s17 + $0x230] sm:$0xff] %vm944_vm0, %v657_v8 }
 0x11e   : > { %v672_v9 = vpop.permute.xlu1 %671  ;;  %v667_v10 = vpop.permute.xlu0 %666 }
 0x11f   : > { %1018 = vst.msk [vmem:[%s1909_s17 + $0x248] sm:$0xff] %vm944_vm0, %v672_v9  ;;  %1017 = vst.msk [vmem:[%s1909_s17 + $0x240] sm:$0xff] %vm944_vm0, %v667_v10 }
 0x122   : > { %v682_v11 = vpop.permute.xlu1 %681  ;;  %v677_v12 = vpop.permute.xlu0 %676 }
 0x123   : > { %1020 = vst.msk [vmem:[%s1909_s17 + $0x258] sm:$0xff] %vm944_vm0, %v682_v11  ;;  %1019 = vst.msk [vmem:[%s1909_s17 + $0x250] sm:$0xff] %vm944_vm0, %v677_v12 }
 0x126   : > { %v692_v13 = vpop.permute.xlu1 %691  ;;  %v687_v14 = vpop.permute.xlu0 %686 }
 0x127   : > { %1022 = vst.msk [vmem:[%s1909_s17 + $0x268] sm:$0xff] %vm944_vm0, %v692_v13  ;;  %1021 = vst.msk [vmem:[%s1909_s17 + $0x260] sm:$0xff] %vm944_vm0, %v687_v14 }
 0x12a   : > { %v702_v15 = vpop.permute.xlu1 %701  ;;  %v697_v16 = vpop.permute.xlu0 %696 }
 0x12b   : > { %1024 = vst.msk [vmem:[%s1909_s17 + $0x278] sm:$0xff] %vm944_vm0, %v702_v15  ;;  %1023 = vst.msk [vmem:[%s1909_s17 + $0x270] sm:$0xff] %vm944_vm0, %v697_v16 }
 0x12e   : > { %v712_v17 = vpop.permute.xlu1 %711  ;;  %v707_v18 = vpop.permute.xlu0 %706 }
 0x12f   : > { %1026 = vst.msk [vmem:[%s1909_s17 + $0x288] sm:$0xff] %vm944_vm0, %v712_v17  ;;  %1025 = vst.msk [vmem:[%s1909_s17 + $0x280] sm:$0xff] %vm944_vm0, %v707_v18 }
 0x132   : > { %v722_v19 = vpop.permute.xlu1 %721  ;;  %v717_v20 = vpop.permute.xlu0 %716 }
 0x133   : > { %1028 = vst.msk [vmem:[%s1909_s17 + $0x298] sm:$0xff] %vm944_vm0, %v722_v19  ;;  %1027 = vst.msk [vmem:[%s1909_s17 + $0x290] sm:$0xff] %vm944_vm0, %v717_v20 }
 0x136   : > { %v732_v21 = vpop.permute.xlu1 %731  ;;  %v727_v22 = vpop.permute.xlu0 %726 }
 0x137   : > { %1030 = vst.msk [vmem:[%s1909_s17 + $0x2a8] sm:$0xff] %vm944_vm0, %v732_v21  ;;  %1029 = vst.msk [vmem:[%s1909_s17 + $0x2a0] sm:$0xff] %vm944_vm0, %v727_v22 }
 0x13a   : > { %v742_v23 = vpop.permute.xlu1 %741  ;;  %v737_v24 = vpop.permute.xlu0 %736 }
 0x13b   : > { %1032 = vst.msk [vmem:[%s1909_s17 + $0x2b8] sm:$0xff] %vm944_vm0, %v742_v23  ;;  %1031 = vst.msk [vmem:[%s1909_s17 + $0x2b0] sm:$0xff] %vm944_vm0, %v737_v24 }
 0x13e   : > { %v752_v25 = vpop.permute.xlu1 %751  ;;  %v747_v26 = vpop.permute.xlu0 %746 }
 0x13f   : > { %1034 = vst.msk [vmem:[%s1909_s17 + $0x2c8] sm:$0xff] %vm944_vm0, %v752_v25  ;;  %1033 = vst.msk [vmem:[%s1909_s17 + $0x2c0] sm:$0xff] %vm944_vm0, %v747_v26 }
 0x142   : > { %v762_v27 = vpop.permute.xlu1 %761  ;;  %v757_v28 = vpop.permute.xlu0 %756 }
 0x143   : > { %1036 = vst.msk [vmem:[%s1909_s17 + $0x2d8] sm:$0xff] %vm944_vm0, %v762_v27  ;;  %1035 = vst.msk [vmem:[%s1909_s17 + $0x2d0] sm:$0xff] %vm944_vm0, %v757_v28 }
 0x146   : > { %v772_v29 = vpop.permute.xlu1 %771  ;;  %v767_v30 = vpop.permute.xlu0 %766 }
 0x147   : > { %1038 = vst.msk [vmem:[%s1909_s17 + $0x2e8] sm:$0xff] %vm944_vm0, %v772_v29  ;;  %1037 = vst.msk [vmem:[%s1909_s17 + $0x2e0] sm:$0xff] %vm944_vm0, %v767_v30 }
 0x14a   : > { %v782_v31 = vpop.permute.xlu1 %781  ;;  %v777_v32 = vpop.permute.xlu0 %776 }
 0x14b   : > { %1040 = vst.msk [vmem:[%s1909_s17 + $0x2f8] sm:$0xff] %vm944_vm0, %v782_v31  ;;  %1039 = vst.msk [vmem:[%s1909_s17 + $0x2f0] sm:$0xff] %vm944_vm0, %v777_v32 }
 0x14e   : > { %v792_v33 = vpop.permute.xlu1 %791  ;;  %v787_v34 = vpop.permute.xlu0 %786 }
 0x14f   : > { %1042 = vst.msk [vmem:[%s1909_s17 + $0x308] sm:$0xff] %vm944_vm0, %v792_v33  ;;  %1041 = vst.msk [vmem:[%s1909_s17 + $0x300] sm:$0xff] %vm944_vm0, %v787_v34 }
 0x152   : > { %v802_v35 = vpop.permute.xlu1 %801  ;;  %v797_v36 = vpop.permute.xlu0 %796 }
 0x153   : > { %1044 = vst.msk [vmem:[%s1909_s17 + $0x318] sm:$0xff] %vm944_vm0, %v802_v35  ;;  %1043 = vst.msk [vmem:[%s1909_s17 + $0x310] sm:$0xff] %vm944_vm0, %v797_v36 }
 0x156   : > { %v812_v37 = vpop.permute.xlu1 %811  ;;  %v807_v38 = vpop.permute.xlu0 %806 }
 0x157   : > { %1046 = vst.msk [vmem:[%s1909_s17 + $0x328] sm:$0xff] %vm944_vm0, %v812_v37  ;;  %1045 = vst.msk [vmem:[%s1909_s17 + $0x320] sm:$0xff] %vm944_vm0, %v807_v38 }
 0x15a   : > { %v822_v39 = vpop.permute.xlu1 %821  ;;  %v817_v40 = vpop.permute.xlu0 %816 }
 0x15b   : > { %1048 = vst.msk [vmem:[%s1909_s17 + $0x338] sm:$0xff] %vm944_vm0, %v822_v39  ;;  %1047 = vst.msk [vmem:[%s1909_s17 + $0x330] sm:$0xff] %vm944_vm0, %v817_v40 }
 0x15e   : > { %v832_v41 = vpop.permute.xlu1 %831  ;;  %v827_v42 = vpop.permute.xlu0 %826 }
 0x15f   : > { %1050 = vst.msk [vmem:[%s1909_s17 + $0x348] sm:$0xff] %vm944_vm0, %v832_v41  ;;  %1049 = vst.msk [vmem:[%s1909_s17 + $0x340] sm:$0xff] %vm944_vm0, %v827_v42 }
 0x162   : > { %v842_v43 = vpop.permute.xlu1 %841  ;;  %v837_v44 = vpop.permute.xlu0 %836 }
 0x163   : > { %1052 = vst.msk [vmem:[%s1909_s17 + $0x358] sm:$0xff] %vm944_vm0, %v842_v43  ;;  %1051 = vst.msk [vmem:[%s1909_s17 + $0x350] sm:$0xff] %vm944_vm0, %v837_v44 }
 0x166   : > { %v852_v45 = vpop.permute.xlu1 %851  ;;  %v847_v46 = vpop.permute.xlu0 %846 }
 0x167   : > { %1054 = vst.msk [vmem:[%s1909_s17 + $0x368] sm:$0xff] %vm944_vm0, %v852_v45  ;;  %1053 = vst.msk [vmem:[%s1909_s17 + $0x360] sm:$0xff] %vm944_vm0, %v847_v46 }
 0x16a   : > { %v862_v47 = vpop.permute.xlu1 %861  ;;  %v857_v48 = vpop.permute.xlu0 %856 }
 0x16b   : > { %1056 = vst.msk [vmem:[%s1909_s17 + $0x378] sm:$0xff] %vm944_vm0, %v862_v47  ;;  %1055 = vst.msk [vmem:[%s1909_s17 + $0x370] sm:$0xff] %vm944_vm0, %v857_v48 }
 0x16e   : > { %v872_v49 = vpop.permute.xlu1 %871  ;;  %v867_v50 = vpop.permute.xlu0 %866 }
 0x16f   : > { %1058 = vst.msk [vmem:[%s1909_s17 + $0x388] sm:$0xff] %vm944_vm0, %v872_v49  ;;  %1057 = vst.msk [vmem:[%s1909_s17 + $0x380] sm:$0xff] %vm944_vm0, %v867_v50 }
 0x172   : > { %v882_v51 = vpop.permute.xlu1 %881  ;;  %v877_v52 = vpop.permute.xlu0 %876 }
 0x173   : > { %1060 = vst.msk [vmem:[%s1909_s17 + $0x398] sm:$0xff] %vm944_vm0, %v882_v51  ;;  %1059 = vst.msk [vmem:[%s1909_s17 + $0x390] sm:$0xff] %vm944_vm0, %v877_v52 }
 0x176   : > { %v892_v53 = vpop.permute.xlu1 %891  ;;  %v887_v54 = vpop.permute.xlu0 %886 }
 0x177   : > { %1062 = vst.msk [vmem:[%s1909_s17 + $0x3a8] sm:$0xff] %vm944_vm0, %v892_v53  ;;  %1061 = vst.msk [vmem:[%s1909_s17 + $0x3a0] sm:$0xff] %vm944_vm0, %v887_v54 }
 0x17a   : > { %v902_v55 = vpop.permute.xlu1 %901  ;;  %v897_v56 = vpop.permute.xlu0 %896 }
 0x17b   : > { %1064 = vst.msk [vmem:[%s1909_s17 + $0x3b8] sm:$0xff] %vm944_vm0, %v902_v55  ;;  %1063 = vst.msk [vmem:[%s1909_s17 + $0x3b0] sm:$0xff] %vm944_vm0, %v897_v56 }
 0x17e   : > { %v912_v57 = vpop.permute.xlu1 %911  ;;  %v907_v58 = vpop.permute.xlu0 %906 }
 0x17f   : > { %1066 = vst.msk [vmem:[%s1909_s17 + $0x3c8] sm:$0xff] %vm944_vm0, %v912_v57  ;;  %1065 = vst.msk [vmem:[%s1909_s17 + $0x3c0] sm:$0xff] %vm944_vm0, %v907_v58 }
 0x182   : > { %v922_v59 = vpop.permute.xlu1 %921  ;;  %v917_v60 = vpop.permute.xlu0 %916 }
 0x183   : > { %1068 = vst.msk [vmem:[%s1909_s17 + $0x3d8] sm:$0xff] %vm944_vm0, %v922_v59  ;;  %1067 = vst.msk [vmem:[%s1909_s17 + $0x3d0] sm:$0xff] %vm944_vm0, %v917_v60 }
 0x186   : > { %v932_v61 = vpop.permute.xlu1 %931  ;;  %v927_v62 = vpop.permute.xlu0 %926 }
 0x187   : > { %1070 = vst.msk [vmem:[%s1909_s17 + $0x3e8] sm:$0xff] %vm944_vm0, %v932_v61  ;;  %1069 = vst.msk [vmem:[%s1909_s17 + $0x3e0] sm:$0xff] %vm944_vm0, %v927_v62 }
 0x18a   : > { %v942_v63 = vpop.permute.xlu1 %941  ;;  %v937_v0 = vpop.permute.xlu0 %936 }
 0x18b   : > { %1072 = vst.msk [vmem:[%s1909_s17 + $0x3f8] sm:$0xff] %vm944_vm0, %v942_v63  ;;  %1071 = vst.msk [vmem:[%s1909_s17 + $0x3f0] sm:$0xff] %vm944_vm0, %v937_v0 }
 0x18c PF: > { %p1750_p6 = scmp.ne.s32.totalorder %s1859_s9, 1 }
 0x18e   : > { %1076 = sbr.rel (%p1750_p6) target bundleno = 468 (0x1d4), region = 36 }
 0x193   : > { %v1751_v1 = vld [vmem:[%s3011_s1] ss:$0 sm:$0xff]  ;;  %vm1525_vm1 = vcmask 130048   ;;  %v1752_v2 = vld [vmem:[%s3011_s1 + $0x1] ss:$0 sm:$0xff] }
 0x194   : > { %1526 = vst.msk [vmem:[%s1909_s17] sm:$0xff] %vm1525_vm1, %v1751_v1  ;;  %1527 = vst.msk [vmem:[%s1909_s17 + $0x8] sm:$0xff] %vm1525_vm1, %v1751_v1  ;;  %v1753_v3 = vld [vmem:[%s3011_s1 + $0x2] ss:$0 sm:$0xff]  ;;  %v1754_v4 = vld [vmem:[%s3011_s1 + $0x3] ss:$0 sm:$0xff] }
 0x195   : > { %1528 = vst.msk [vmem:[%s1909_s17 + $0x10] sm:$0xff] %vm1525_vm1, %v1752_v2  ;;  %1529 = vst.msk [vmem:[%s1909_s17 + $0x18] sm:$0xff] %vm1525_vm1, %v1752_v2  ;;  %v1755_v5 = vld [vmem:[%s3011_s1 + $0x4] ss:$0 sm:$0xff]  ;;  %v1756_v6 = vld [vmem:[%s3011_s1 + $0x5] ss:$0 sm:$0xff] }
 0x196   : > { %1530 = vst.msk [vmem:[%s1909_s17 + $0x20] sm:$0xff] %vm1525_vm1, %v1753_v3  ;;  %1531 = vst.msk [vmem:[%s1909_s17 + $0x28] sm:$0xff] %vm1525_vm1, %v1753_v3  ;;  %v1757_v7 = vld [vmem:[%s3011_s1 + $0x6] ss:$0 sm:$0xff]  ;;  %v1758_v8 = vld [vmem:[%s3011_s1 + $0x7] ss:$0 sm:$0xff] }
 0x197   : > { %1532 = vst.msk [vmem:[%s1909_s17 + $0x30] sm:$0xff] %vm1525_vm1, %v1754_v4  ;;  %1533 = vst.msk [vmem:[%s1909_s17 + $0x38] sm:$0xff] %vm1525_vm1, %v1754_v4  ;;  %v1759_v9 = vld [vmem:[%s3011_s1 + $0x8] ss:$0 sm:$0xff]  ;;  %v1760_v10 = vld [vmem:[%s3011_s1 + $0x9] ss:$0 sm:$0xff] }
 0x198   : > { %1534 = vst.msk [vmem:[%s1909_s17 + $0x40] sm:$0xff] %vm1525_vm1, %v1755_v5  ;;  %1535 = vst.msk [vmem:[%s1909_s17 + $0x48] sm:$0xff] %vm1525_vm1, %v1755_v5  ;;  %v1761_v11 = vld [vmem:[%s3011_s1 + $0xa] ss:$0 sm:$0xff]  ;;  %v1762_v12 = vld [vmem:[%s3011_s1 + $0xb] ss:$0 sm:$0xff] }
 0x199   : > { %1536 = vst.msk [vmem:[%s1909_s17 + $0x50] sm:$0xff] %vm1525_vm1, %v1756_v6  ;;  %1537 = vst.msk [vmem:[%s1909_s17 + $0x58] sm:$0xff] %vm1525_vm1, %v1756_v6  ;;  %v1763_v13 = vld [vmem:[%s3011_s1 + $0xc] ss:$0 sm:$0xff]  ;;  %v1764_v14 = vld [vmem:[%s3011_s1 + $0xd] ss:$0 sm:$0xff] }
 0x19a   : > { %1538 = vst.msk [vmem:[%s1909_s17 + $0x60] sm:$0xff] %vm1525_vm1, %v1757_v7  ;;  %1539 = vst.msk [vmem:[%s1909_s17 + $0x68] sm:$0xff] %vm1525_vm1, %v1757_v7  ;;  %v1765_v15 = vld [vmem:[%s3011_s1 + $0xe] ss:$0 sm:$0xff]  ;;  %v1766_v16 = vld [vmem:[%s3011_s1 + $0xf] ss:$0 sm:$0xff] }
 0x19b   : > { %1540 = vst.msk [vmem:[%s1909_s17 + $0x70] sm:$0xff] %vm1525_vm1, %v1758_v8  ;;  %1541 = vst.msk [vmem:[%s1909_s17 + $0x78] sm:$0xff] %vm1525_vm1, %v1758_v8  ;;  %v1767_v17 = vld [vmem:[%s3011_s1 + $0x10] ss:$0 sm:$0xff]  ;;  %v1768_v18 = vld [vmem:[%s3011_s1 + $0x11] ss:$0 sm:$0xff] }
 0x19c   : > { %1542 = vst.msk [vmem:[%s1909_s17 + $0x80] sm:$0xff] %vm1525_vm1, %v1759_v9  ;;  %1543 = vst.msk [vmem:[%s1909_s17 + $0x88] sm:$0xff] %vm1525_vm1, %v1759_v9  ;;  %v1769_v19 = vld [vmem:[%s3011_s1 + $0x12] ss:$0 sm:$0xff]  ;;  %v1770_v20 = vld [vmem:[%s3011_s1 + $0x13] ss:$0 sm:$0xff] }
 0x19d   : > { %1544 = vst.msk [vmem:[%s1909_s17 + $0x90] sm:$0xff] %vm1525_vm1, %v1760_v10  ;;  %1545 = vst.msk [vmem:[%s1909_s17 + $0x98] sm:$0xff] %vm1525_vm1, %v1760_v10  ;;  %v1771_v21 = vld [vmem:[%s3011_s1 + $0x14] ss:$0 sm:$0xff]  ;;  %v1772_v22 = vld [vmem:[%s3011_s1 + $0x15] ss:$0 sm:$0xff] }
 0x19e   : > { %1546 = vst.msk [vmem:[%s1909_s17 + $0xa0] sm:$0xff] %vm1525_vm1, %v1761_v11  ;;  %1547 = vst.msk [vmem:[%s1909_s17 + $0xa8] sm:$0xff] %vm1525_vm1, %v1761_v11  ;;  %v1773_v23 = vld [vmem:[%s3011_s1 + $0x16] ss:$0 sm:$0xff]  ;;  %v1774_v24 = vld [vmem:[%s3011_s1 + $0x17] ss:$0 sm:$0xff] }
 0x19f   : > { %1548 = vst.msk [vmem:[%s1909_s17 + $0xb0] sm:$0xff] %vm1525_vm1, %v1762_v12  ;;  %1549 = vst.msk [vmem:[%s1909_s17 + $0xb8] sm:$0xff] %vm1525_vm1, %v1762_v12  ;;  %v1775_v25 = vld [vmem:[%s3011_s1 + $0x18] ss:$0 sm:$0xff]  ;;  %v1776_v26 = vld [vmem:[%s3011_s1 + $0x19] ss:$0 sm:$0xff] }
 0x1a0   : > { %1550 = vst.msk [vmem:[%s1909_s17 + $0xc0] sm:$0xff] %vm1525_vm1, %v1763_v13  ;;  %1551 = vst.msk [vmem:[%s1909_s17 + $0xc8] sm:$0xff] %vm1525_vm1, %v1763_v13  ;;  %v1777_v27 = vld [vmem:[%s3011_s1 + $0x1a] ss:$0 sm:$0xff]  ;;  %v1778_v28 = vld [vmem:[%s3011_s1 + $0x1b] ss:$0 sm:$0xff] }
 0x1a1   : > { %1552 = vst.msk [vmem:[%s1909_s17 + $0xd0] sm:$0xff] %vm1525_vm1, %v1764_v14  ;;  %1553 = vst.msk [vmem:[%s1909_s17 + $0xd8] sm:$0xff] %vm1525_vm1, %v1764_v14  ;;  %v1779_v29 = vld [vmem:[%s3011_s1 + $0x1c] ss:$0 sm:$0xff]  ;;  %v1780_v30 = vld [vmem:[%s3011_s1 + $0x1d] ss:$0 sm:$0xff] }
 0x1a2   : > { %1554 = vst.msk [vmem:[%s1909_s17 + $0xe0] sm:$0xff] %vm1525_vm1, %v1765_v15  ;;  %1555 = vst.msk [vmem:[%s1909_s17 + $0xe8] sm:$0xff] %vm1525_vm1, %v1765_v15  ;;  %v1781_v31 = vld [vmem:[%s3011_s1 + $0x1e] ss:$0 sm:$0xff]  ;;  %v1782_v32 = vld [vmem:[%s3011_s1 + $0x1f] ss:$0 sm:$0xff] }
 0x1a3   : > { %1556 = vst.msk [vmem:[%s1909_s17 + $0xf0] sm:$0xff] %vm1525_vm1, %v1766_v16  ;;  %1557 = vst.msk [vmem:[%s1909_s17 + $0xf8] sm:$0xff] %vm1525_vm1, %v1766_v16  ;;  %v1783_v33 = vld [vmem:[%s3011_s1 + $0x20] ss:$0 sm:$0xff]  ;;  %v1784_v34 = vld [vmem:[%s3011_s1 + $0x21] ss:$0 sm:$0xff] }
 0x1a4   : > { %1558 = vst.msk [vmem:[%s1909_s17 + $0x100] sm:$0xff] %vm1525_vm1, %v1767_v17  ;;  %1559 = vst.msk [vmem:[%s1909_s17 + $0x108] sm:$0xff] %vm1525_vm1, %v1767_v17  ;;  %v1785_v35 = vld [vmem:[%s3011_s1 + $0x22] ss:$0 sm:$0xff]  ;;  %v1786_v36 = vld [vmem:[%s3011_s1 + $0x23] ss:$0 sm:$0xff] }
 0x1a5   : > { %1560 = vst.msk [vmem:[%s1909_s17 + $0x110] sm:$0xff] %vm1525_vm1, %v1768_v18  ;;  %1561 = vst.msk [vmem:[%s1909_s17 + $0x118] sm:$0xff] %vm1525_vm1, %v1768_v18  ;;  %v1787_v37 = vld [vmem:[%s3011_s1 + $0x24] ss:$0 sm:$0xff]  ;;  %v1788_v38 = vld [vmem:[%s3011_s1 + $0x25] ss:$0 sm:$0xff] }
 0x1a6   : > { %1562 = vst.msk [vmem:[%s1909_s17 + $0x120] sm:$0xff] %vm1525_vm1, %v1769_v19  ;;  %1563 = vst.msk [vmem:[%s1909_s17 + $0x128] sm:$0xff] %vm1525_vm1, %v1769_v19  ;;  %v1789_v39 = vld [vmem:[%s3011_s1 + $0x26] ss:$0 sm:$0xff]  ;;  %v1790_v40 = vld [vmem:[%s3011_s1 + $0x27] ss:$0 sm:$0xff] }
 0x1a7   : > { %1564 = vst.msk [vmem:[%s1909_s17 + $0x130] sm:$0xff] %vm1525_vm1, %v1770_v20  ;;  %1565 = vst.msk [vmem:[%s1909_s17 + $0x138] sm:$0xff] %vm1525_vm1, %v1770_v20  ;;  %v1791_v41 = vld [vmem:[%s3011_s1 + $0x28] ss:$0 sm:$0xff]  ;;  %v1792_v42 = vld [vmem:[%s3011_s1 + $0x29] ss:$0 sm:$0xff] }
 0x1a8   : > { %1566 = vst.msk [vmem:[%s1909_s17 + $0x140] sm:$0xff] %vm1525_vm1, %v1771_v21  ;;  %1567 = vst.msk [vmem:[%s1909_s17 + $0x148] sm:$0xff] %vm1525_vm1, %v1771_v21  ;;  %v1793_v43 = vld [vmem:[%s3011_s1 + $0x2a] ss:$0 sm:$0xff]  ;;  %v1794_v44 = vld [vmem:[%s3011_s1 + $0x2b] ss:$0 sm:$0xff] }
 0x1a9   : > { %1568 = vst.msk [vmem:[%s1909_s17 + $0x150] sm:$0xff] %vm1525_vm1, %v1772_v22  ;;  %1569 = vst.msk [vmem:[%s1909_s17 + $0x158] sm:$0xff] %vm1525_vm1, %v1772_v22  ;;  %v1795_v45 = vld [vmem:[%s3011_s1 + $0x2c] ss:$0 sm:$0xff]  ;;  %v1796_v46 = vld [vmem:[%s3011_s1 + $0x2d] ss:$0 sm:$0xff] }
 0x1aa   : > { %1570 = vst.msk [vmem:[%s1909_s17 + $0x160] sm:$0xff] %vm1525_vm1, %v1773_v23  ;;  %1571 = vst.msk [vmem:[%s1909_s17 + $0x168] sm:$0xff] %vm1525_vm1, %v1773_v23  ;;  %v1797_v47 = vld [vmem:[%s3011_s1 + $0x2e] ss:$0 sm:$0xff]  ;;  %v1798_v48 = vld [vmem:[%s3011_s1 + $0x2f] ss:$0 sm:$0xff] }
 0x1ab   : > { %1572 = vst.msk [vmem:[%s1909_s17 + $0x170] sm:$0xff] %vm1525_vm1, %v1774_v24  ;;  %1573 = vst.msk [vmem:[%s1909_s17 + $0x178] sm:$0xff] %vm1525_vm1, %v1774_v24  ;;  %v1799_v49 = vld [vmem:[%s3011_s1 + $0x30] ss:$0 sm:$0xff]  ;;  %v1800_v50 = vld [vmem:[%s3011_s1 + $0x31] ss:$0 sm:$0xff] }
 0x1ac   : > { %1574 = vst.msk [vmem:[%s1909_s17 + $0x180] sm:$0xff] %vm1525_vm1, %v1775_v25  ;;  %1575 = vst.msk [vmem:[%s1909_s17 + $0x188] sm:$0xff] %vm1525_vm1, %v1775_v25  ;;  %v1801_v51 = vld [vmem:[%s3011_s1 + $0x32] ss:$0 sm:$0xff]  ;;  %v1802_v52 = vld [vmem:[%s3011_s1 + $0x33] ss:$0 sm:$0xff] }
 0x1ad   : > { %1576 = vst.msk [vmem:[%s1909_s17 + $0x190] sm:$0xff] %vm1525_vm1, %v1776_v26  ;;  %1577 = vst.msk [vmem:[%s1909_s17 + $0x198] sm:$0xff] %vm1525_vm1, %v1776_v26  ;;  %v1803_v53 = vld [vmem:[%s3011_s1 + $0x34] ss:$0 sm:$0xff]  ;;  %v1804_v54 = vld [vmem:[%s3011_s1 + $0x35] ss:$0 sm:$0xff] }
 0x1ae   : > { %1578 = vst.msk [vmem:[%s1909_s17 + $0x1a0] sm:$0xff] %vm1525_vm1, %v1777_v27  ;;  %1579 = vst.msk [vmem:[%s1909_s17 + $0x1a8] sm:$0xff] %vm1525_vm1, %v1777_v27  ;;  %v1805_v55 = vld [vmem:[%s3011_s1 + $0x36] ss:$0 sm:$0xff]  ;;  %v1806_v56 = vld [vmem:[%s3011_s1 + $0x37] ss:$0 sm:$0xff] }
 0x1af   : > { %1580 = vst.msk [vmem:[%s1909_s17 + $0x1b0] sm:$0xff] %vm1525_vm1, %v1778_v28  ;;  %1581 = vst.msk [vmem:[%s1909_s17 + $0x1b8] sm:$0xff] %vm1525_vm1, %v1778_v28  ;;  %v1807_v57 = vld [vmem:[%s3011_s1 + $0x38] ss:$0 sm:$0xff]  ;;  %v1808_v58 = vld [vmem:[%s3011_s1 + $0x39] ss:$0 sm:$0xff] }
 0x1b0   : > { %1582 = vst.msk [vmem:[%s1909_s17 + $0x1c0] sm:$0xff] %vm1525_vm1, %v1779_v29  ;;  %1583 = vst.msk [vmem:[%s1909_s17 + $0x1c8] sm:$0xff] %vm1525_vm1, %v1779_v29  ;;  %v1809_v59 = vld [vmem:[%s3011_s1 + $0x3a] ss:$0 sm:$0xff]  ;;  %v1810_v60 = vld [vmem:[%s3011_s1 + $0x3b] ss:$0 sm:$0xff] }
 0x1b1   : > { %1584 = vst.msk [vmem:[%s1909_s17 + $0x1d0] sm:$0xff] %vm1525_vm1, %v1780_v30  ;;  %1585 = vst.msk [vmem:[%s1909_s17 + $0x1d8] sm:$0xff] %vm1525_vm1, %v1780_v30  ;;  %v1811_v61 = vld [vmem:[%s3011_s1 + $0x3c] ss:$0 sm:$0xff]  ;;  %v1812_v62 = vld [vmem:[%s3011_s1 + $0x3d] ss:$0 sm:$0xff] }
 0x1b2   : > { %1586 = vst.msk [vmem:[%s1909_s17 + $0x1e0] sm:$0xff] %vm1525_vm1, %v1781_v31  ;;  %1587 = vst.msk [vmem:[%s1909_s17 + $0x1e8] sm:$0xff] %vm1525_vm1, %v1781_v31  ;;  %v1813_v63 = vld [vmem:[%s3011_s1 + $0x3e] ss:$0 sm:$0xff]  ;;  %v1814_v0 = vld [vmem:[%s3011_s1 + $0x3f] ss:$0 sm:$0xff] }
 0x1b3   : > { %1588 = vst.msk [vmem:[%s1909_s17 + $0x1f0] sm:$0xff] %vm1525_vm1, %v1782_v32  ;;  %1589 = vst.msk [vmem:[%s1909_s17 + $0x1f8] sm:$0xff] %vm1525_vm1, %v1782_v32 }
 0x1b4   : > { %1590 = vst.msk [vmem:[%s1909_s17 + $0x200] sm:$0xff] %vm1525_vm1, %v1783_v33  ;;  %1591 = vst.msk [vmem:[%s1909_s17 + $0x208] sm:$0xff] %vm1525_vm1, %v1783_v33 }
 0x1b5   : > { %1592 = vst.msk [vmem:[%s1909_s17 + $0x210] sm:$0xff] %vm1525_vm1, %v1784_v34  ;;  %1593 = vst.msk [vmem:[%s1909_s17 + $0x218] sm:$0xff] %vm1525_vm1, %v1784_v34 }
 0x1b6   : > { %1594 = vst.msk [vmem:[%s1909_s17 + $0x220] sm:$0xff] %vm1525_vm1, %v1785_v35  ;;  %1595 = vst.msk [vmem:[%s1909_s17 + $0x228] sm:$0xff] %vm1525_vm1, %v1785_v35 }
 0x1b7   : > { %1596 = vst.msk [vmem:[%s1909_s17 + $0x230] sm:$0xff] %vm1525_vm1, %v1786_v36  ;;  %1597 = vst.msk [vmem:[%s1909_s17 + $0x238] sm:$0xff] %vm1525_vm1, %v1786_v36 }
 0x1b8   : > { %1598 = vst.msk [vmem:[%s1909_s17 + $0x240] sm:$0xff] %vm1525_vm1, %v1787_v37  ;;  %1599 = vst.msk [vmem:[%s1909_s17 + $0x248] sm:$0xff] %vm1525_vm1, %v1787_v37 }
 0x1b9   : > { %1600 = vst.msk [vmem:[%s1909_s17 + $0x250] sm:$0xff] %vm1525_vm1, %v1788_v38  ;;  %1601 = vst.msk [vmem:[%s1909_s17 + $0x258] sm:$0xff] %vm1525_vm1, %v1788_v38 }
 0x1ba   : > { %1602 = vst.msk [vmem:[%s1909_s17 + $0x260] sm:$0xff] %vm1525_vm1, %v1789_v39  ;;  %1603 = vst.msk [vmem:[%s1909_s17 + $0x268] sm:$0xff] %vm1525_vm1, %v1789_v39 }
 0x1bb   : > { %1604 = vst.msk [vmem:[%s1909_s17 + $0x270] sm:$0xff] %vm1525_vm1, %v1790_v40  ;;  %1605 = vst.msk [vmem:[%s1909_s17 + $0x278] sm:$0xff] %vm1525_vm1, %v1790_v40 }
 0x1bc   : > { %1606 = vst.msk [vmem:[%s1909_s17 + $0x280] sm:$0xff] %vm1525_vm1, %v1791_v41  ;;  %1607 = vst.msk [vmem:[%s1909_s17 + $0x288] sm:$0xff] %vm1525_vm1, %v1791_v41 }
 0x1bd   : > { %1608 = vst.msk [vmem:[%s1909_s17 + $0x290] sm:$0xff] %vm1525_vm1, %v1792_v42  ;;  %1609 = vst.msk [vmem:[%s1909_s17 + $0x298] sm:$0xff] %vm1525_vm1, %v1792_v42 }
 0x1be   : > { %1610 = vst.msk [vmem:[%s1909_s17 + $0x2a0] sm:$0xff] %vm1525_vm1, %v1793_v43  ;;  %1611 = vst.msk [vmem:[%s1909_s17 + $0x2a8] sm:$0xff] %vm1525_vm1, %v1793_v43 }
 0x1bf   : > { %1612 = vst.msk [vmem:[%s1909_s17 + $0x2b0] sm:$0xff] %vm1525_vm1, %v1794_v44  ;;  %1613 = vst.msk [vmem:[%s1909_s17 + $0x2b8] sm:$0xff] %vm1525_vm1, %v1794_v44 }
 0x1c0   : > { %1614 = vst.msk [vmem:[%s1909_s17 + $0x2c0] sm:$0xff] %vm1525_vm1, %v1795_v45  ;;  %1615 = vst.msk [vmem:[%s1909_s17 + $0x2c8] sm:$0xff] %vm1525_vm1, %v1795_v45 }
 0x1c1   : > { %1616 = vst.msk [vmem:[%s1909_s17 + $0x2d0] sm:$0xff] %vm1525_vm1, %v1796_v46  ;;  %1617 = vst.msk [vmem:[%s1909_s17 + $0x2d8] sm:$0xff] %vm1525_vm1, %v1796_v46 }
 0x1c2   : > { %1618 = vst.msk [vmem:[%s1909_s17 + $0x2e0] sm:$0xff] %vm1525_vm1, %v1797_v47  ;;  %1619 = vst.msk [vmem:[%s1909_s17 + $0x2e8] sm:$0xff] %vm1525_vm1, %v1797_v47 }
 0x1c3   : > { %1620 = vst.msk [vmem:[%s1909_s17 + $0x2f0] sm:$0xff] %vm1525_vm1, %v1798_v48  ;;  %1621 = vst.msk [vmem:[%s1909_s17 + $0x2f8] sm:$0xff] %vm1525_vm1, %v1798_v48 }
 0x1c4   : > { %1622 = vst.msk [vmem:[%s1909_s17 + $0x300] sm:$0xff] %vm1525_vm1, %v1799_v49  ;;  %1623 = vst.msk [vmem:[%s1909_s17 + $0x308] sm:$0xff] %vm1525_vm1, %v1799_v49 }
 0x1c5   : > { %1624 = vst.msk [vmem:[%s1909_s17 + $0x310] sm:$0xff] %vm1525_vm1, %v1800_v50  ;;  %1625 = vst.msk [vmem:[%s1909_s17 + $0x318] sm:$0xff] %vm1525_vm1, %v1800_v50 }
 0x1c6   : > { %1626 = vst.msk [vmem:[%s1909_s17 + $0x320] sm:$0xff] %vm1525_vm1, %v1801_v51  ;;  %1627 = vst.msk [vmem:[%s1909_s17 + $0x328] sm:$0xff] %vm1525_vm1, %v1801_v51 }
 0x1c7   : > { %1628 = vst.msk [vmem:[%s1909_s17 + $0x330] sm:$0xff] %vm1525_vm1, %v1802_v52  ;;  %1629 = vst.msk [vmem:[%s1909_s17 + $0x338] sm:$0xff] %vm1525_vm1, %v1802_v52 }
 0x1c8   : > { %1630 = vst.msk [vmem:[%s1909_s17 + $0x340] sm:$0xff] %vm1525_vm1, %v1803_v53  ;;  %1631 = vst.msk [vmem:[%s1909_s17 + $0x348] sm:$0xff] %vm1525_vm1, %v1803_v53 }
 0x1c9   : > { %1632 = vst.msk [vmem:[%s1909_s17 + $0x350] sm:$0xff] %vm1525_vm1, %v1804_v54  ;;  %1633 = vst.msk [vmem:[%s1909_s17 + $0x358] sm:$0xff] %vm1525_vm1, %v1804_v54 }
 0x1ca   : > { %1634 = vst.msk [vmem:[%s1909_s17 + $0x360] sm:$0xff] %vm1525_vm1, %v1805_v55  ;;  %1635 = vst.msk [vmem:[%s1909_s17 + $0x368] sm:$0xff] %vm1525_vm1, %v1805_v55 }
 0x1cb   : > { %1636 = vst.msk [vmem:[%s1909_s17 + $0x370] sm:$0xff] %vm1525_vm1, %v1806_v56  ;;  %1637 = vst.msk [vmem:[%s1909_s17 + $0x378] sm:$0xff] %vm1525_vm1, %v1806_v56 }
 0x1cc   : > { %1638 = vst.msk [vmem:[%s1909_s17 + $0x380] sm:$0xff] %vm1525_vm1, %v1807_v57  ;;  %1639 = vst.msk [vmem:[%s1909_s17 + $0x388] sm:$0xff] %vm1525_vm1, %v1807_v57 }
 0x1cd   : > { %1640 = vst.msk [vmem:[%s1909_s17 + $0x390] sm:$0xff] %vm1525_vm1, %v1808_v58  ;;  %1641 = vst.msk [vmem:[%s1909_s17 + $0x398] sm:$0xff] %vm1525_vm1, %v1808_v58 }
 0x1ce   : > { %1642 = vst.msk [vmem:[%s1909_s17 + $0x3a0] sm:$0xff] %vm1525_vm1, %v1809_v59  ;;  %1643 = vst.msk [vmem:[%s1909_s17 + $0x3a8] sm:$0xff] %vm1525_vm1, %v1809_v59 }
 0x1cf   : > { %1644 = vst.msk [vmem:[%s1909_s17 + $0x3b0] sm:$0xff] %vm1525_vm1, %v1810_v60  ;;  %1645 = vst.msk [vmem:[%s1909_s17 + $0x3b8] sm:$0xff] %vm1525_vm1, %v1810_v60 }
 0x1d0   : > { %1646 = vst.msk [vmem:[%s1909_s17 + $0x3c0] sm:$0xff] %vm1525_vm1, %v1811_v61  ;;  %1647 = vst.msk [vmem:[%s1909_s17 + $0x3c8] sm:$0xff] %vm1525_vm1, %v1811_v61 }
 0x1d1   : > { %1648 = vst.msk [vmem:[%s1909_s17 + $0x3d0] sm:$0xff] %vm1525_vm1, %v1812_v62  ;;  %1649 = vst.msk [vmem:[%s1909_s17 + $0x3d8] sm:$0xff] %vm1525_vm1, %v1812_v62 }
 0x1d2   : > { %1650 = vst.msk [vmem:[%s1909_s17 + $0x3e0] sm:$0xff] %vm1525_vm1, %v1813_v63  ;;  %1651 = vst.msk [vmem:[%s1909_s17 + $0x3e8] sm:$0xff] %vm1525_vm1, %v1813_v63 }
 0x1d3   : > { %1652 = vst.msk [vmem:[%s1909_s17 + $0x3f0] sm:$0xff] %vm1525_vm1, %v1814_v0  ;;  %1653 = vst.msk [vmem:[%s1909_s17 + $0x3f8] sm:$0xff] %vm1525_vm1, %v1814_v0 }
 0x1d4 PF: > { %s12_s11 = sadd.s32 1, %s1867_s11   ;;  %s3013_s9 = smov %s1863_s10 }
 0x1d5   : > { %p9_p7 = scmp.ge.s32.totalorder %s12_s11, 4   ;;  %s3014_s10 = smov %s3016_s12 }
 0x1d7   :  { %11 = sbr.rel (!%p9_p7) target bundleno = 2 (0x2), region = 66 }

</bundles_post_ra>
